<compile_context>
chip_gen: v5e
topology: v5e:2x2
jax: 0.10.0
libtpu: 0.0.40
codegen_flags: <defaults>
</compile_context>

<pallas_src>
import jax
import jax.numpy as jnp
from jax.experimental import pallas as pl
from jax.experimental.pallas import tpu as pltpu

_MiB = 1024 * 1024


def _ca_kernel(x_ref, w1_ref, b1_ref, w2_ref, b2_ref, o_ref):
    # x_ref : (TB, N, C)   input tile (f32 or bf16)
    # w1_ref: (C, H)       Linear1 weight^T (resident)
    # b1_ref: (1, H)
    # w2_ref: (H, C)       Linear2 weight^T (resident)
    # b2_ref: (1, C)
    # o_ref : (TB, C)
    #
    # Reduce in the input dtype (max is exact in bf16), cast only the small
    # (TB, C) result -> avoids materializing an f32 copy of the whole tile.
    y = jnp.max(x_ref[...], axis=1).astype(jnp.float32)               # (TB, C)
    # fc[0]: Linear(C -> H) + ReLU
    h = jnp.dot(y, w1_ref[...], preferred_element_type=jnp.float32) + b1_ref[...]
    h = jnp.maximum(h, 0.0)
    # fc[2]: Linear(H -> C)
    out = jnp.dot(h, w2_ref[...], preferred_element_type=jnp.float32) + b2_ref[...]
    o_ref[...] = out.astype(o_ref.dtype)


def _padded_row_bytes(N, C, dtype):
    """Bytes one (N, C) plane actually occupies in VMEM ((8,128)-tiled, packed)."""
    itemsize = jnp.dtype(dtype).itemsize
    sub = max(8, 32 // itemsize)            # sublane tile: 8 f32, 16 bf16, 32 int8
    n_pad = -(-N // sub) * sub
    c_pad = -(-C // 128) * 128
    return n_pad * c_pad * itemsize


def _vmem_budget():
    """(x-tile budget bytes [padded, single buffer], vmem_limit_bytes), per chip gen."""
    try:
        cap = pltpu.get_tpu_info().vmem_capacity_bytes
    except Exception:
        cap = None
    if cap is None:
        return 12 * _MiB, 32 * _MiB         # conservative fallback
    if cap >= 100 * _MiB:                   # v5e / v6e: 128 MiB physical VMEM
        return 24 * _MiB, 64 * _MiB
    return 16 * _MiB, 48 * _MiB             # v7x: 64 MiB physical per TC


def _choose_block_b(B, N, C, dtype, budget_bytes):
    """Batch tile: ~budget *padded* bytes of x per step (double-buffered by the
    pipeline, so real x footprint is 2x this), multiple of 8, <= 2048."""
    row = _padded_row_bytes(N, C, dtype)
    tb = budget_bytes // max(1, row)
    tb = max(8, min(int(tb), 2048))
    tb = (tb // 8) * 8
    if tb >= B:
        return B                            # whole array in one block (small-B case)
    return tb


def ca_layer(x, w1, b1, w2, b2, *, block_b=None):
    """x: (B, N, C); w1: (H, C); b1: (H,); w2: (C, H); b2: (C,)  (torch Linear layout).

    x may be f32 or bf16; internal accumulation is f32, output dtype follows x.
    """
    B, N, C = x.shape
    H = w1.shape[0]

    # Glue: pre-transpose weights, reshape biases to 2-D for clean VMEM layout.
    w1_t = jnp.transpose(w1).astype(jnp.float32)     # (C, H)
    w2_t = jnp.transpose(w2).astype(jnp.float32)     # (H, C)
    b1_2d = b1.reshape(1, H).astype(jnp.float32)
    b2_2d = b2.reshape(1, C).astype(jnp.float32)

    budget_bytes, vmem_limit = _vmem_budget()
    if block_b is None:
        block_b = _choose_block_b(B, N, C, x.dtype, budget_bytes)
    block_b = min(block_b, B)

    # Glue: pad B so every grid step is a full in-bounds tile (padded rows are
    # dropped after the call; the max runs over the un-padded N axis, so the
    # padding value cannot leak into valid rows).
    n_blocks = pl.cdiv(B, block_b)
    Bp = n_blocks * block_b
    xp = x if Bp == B else jnp.pad(x, ((0, Bp - B), (0, 0), (0, 0)))

    out2d = pl.pallas_call(
        _ca_kernel,
        out_shape=jax.ShapeDtypeStruct((Bp, C), x.dtype),
        grid_spec=pltpu.PrefetchScalarGridSpec(
            num_scalar_prefetch=0,
            grid=(n_blocks,),
            in_specs=[
                # Streamed: one (block_b, N, C) slab of x per grid step
                # (default Buffered(2) double-buffering; do not deepen).
                pl.BlockSpec((block_b, N, C), lambda i: (i, 0, 0)),
                # Resident (constant block index -> DMA'd once).
                pl.BlockSpec((C, H), lambda i: (0, 0)),
                pl.BlockSpec((1, H), lambda i: (0, 0)),
                pl.BlockSpec((H, C), lambda i: (0, 0)),
                pl.BlockSpec((1, C), lambda i: (0, 0)),
            ],
            out_specs=pl.BlockSpec((block_b, C), lambda i: (i, 0)),
        ),
        compiler_params=pltpu.CompilerParams(
            # "parallel" is safe on every generation; on v7x CORE_PARALLEL on
            # this axis would shard B tiles across both TensorCores.
            dimension_semantics=("parallel",),
            vmem_limit_bytes=vmem_limit,
        ),
    )(xp, w1_t, b1_2d, w2_t, b2_2d)

    if Bp != B:
        out2d = out2d[:B]
    # Glue: final view(b, 1, c)
    return out2d.reshape(B, 1, C)


def ca_layer_ref(x, w1, b1, w2, b2):
    """Pure-JAX reference matching the PyTorch CALayer exactly (f32 math)."""
    y = jnp.max(x.astype(jnp.float32), axis=1)      # (B, C)
    h = jnp.maximum(y @ w1.T + b1, 0.0)             # (B, H)
    out = h @ w2.T + b2                             # (B, C)
    return out[:, None, :]                          # (B, 1, C)


if __name__ == "__main__":
    # Module config: dim_ca = C (last axis of x), reduction_ca = 4.
    B, N, C = 20, 8, 16
    reduction_ca = 4
    H = C // reduction_ca

    key = jax.random.PRNGKey(0)
    kx, k1, k2, k3, k4 = jax.random.split(key, 5)

    x = jax.random.normal(kx, (B, N, C), dtype=jnp.float32)
    # Deterministic synthetic params in torch nn.Linear layout (out_features, in_features).
    w1 = jax.random.normal(k1, (H, C), dtype=jnp.float32) * 0.1
    b1 = jax.random.normal(k2, (H,), dtype=jnp.float32) * 0.1
    w2 = jax.random.normal(k3, (C, H), dtype=jnp.float32) * 0.1
    b2 = jax.random.normal(k4, (C,), dtype=jnp.float32) * 0.1

    ref = ca_layer_ref(x, w1, b1, w2, b2)

    # 1) Exact f32 path; block_b=8 exercises a multi-step grid (3 steps) plus
    #    the B-padding path.
    out = jax.block_until_ready(ca_layer(x, w1, b1, w2, b2, block_b=8))
    assert out.shape == (B, 1, C), out.shape
    assert jnp.allclose(out, ref, atol=1e-5, rtol=1e-5), "f32 mismatch vs reference"

    # 2) bf16-x path (the recommended production dtype: halves HBM reads);
    #    auto block_b exercises the padded-byte VMEM budgeting.
    x_bf16 = x.astype(jnp.bfloat16)
    out_bf16 = jax.block_until_ready(ca_layer(x_bf16, w1, b1, w2, b2))
    assert out_bf16.shape == (B, 1, C), out_bf16.shape
    assert jnp.allclose(out_bf16.astype(jnp.float32), ref, atol=2e-2, rtol=2e-2), \
        "bf16 mismatch vs reference"

    print("KERNEL_OK")
</pallas_src>

<mosaic_0001>
module attributes {stable_mosaic.version = 11 : i64} {
  func.func @_ca_kernel(%arg0: i32, %arg1: memref<8x8x16xf32, #tpu.memory_space<vmem>>, %arg2: memref<16x4xf32, #tpu.memory_space<vmem>>, %arg3: memref<1x4xf32, #tpu.memory_space<vmem>>, %arg4: memref<4x16xf32, #tpu.memory_space<vmem>>, %arg5: memref<1x16xf32, #tpu.memory_space<vmem>>, %arg6: memref<8x16xf32, #tpu.memory_space<vmem>>) attributes {dimension_semantics = [#tpu.dimension_semantics<parallel>], iteration_bounds = array<i64: 3>, scalar_prefetch = 0 : i64, scratch_operands = 0 : i64, tpu.core_type = #tpu.core_type<tc>, window_params = [{transform_indices = @transform_0, window_bounds = array<i64: 8, 8, 16>}, {pipeline_mode = #tpu.pipeline_mode<synchronous>, transform_indices = @transform_1, window_bounds = array<i64: 16, 4>}, {pipeline_mode = #tpu.pipeline_mode<synchronous>, transform_indices = @transform_2, window_bounds = array<i64: 1, 4>}, {pipeline_mode = #tpu.pipeline_mode<synchronous>, transform_indices = @transform_3, window_bounds = array<i64: 4, 16>}, {pipeline_mode = #tpu.pipeline_mode<synchronous>, transform_indices = @transform_4, window_bounds = array<i64: 1, 16>}, {transform_indices = @transform_5, window_bounds = array<i64: 8, 16>}]} {
    %c0 = arith.constant 0 : index
    %c0_0 = arith.constant 0 : index
    %c0_1 = arith.constant 0 : index
    %0 = vector.load %arg1[%c0, %c0_0, %c0_1] : memref<8x8x16xf32, #tpu.memory_space<vmem>>, vector<8x8x16xf32>
    %cst = arith.constant dense<0xFF800000> : vector<8x16xf32>
    %1 = vector.multi_reduction <maximumf>, %0, %cst [1] : vector<8x8x16xf32> to vector<8x16xf32>
    %c0_2 = arith.constant 0 : index
    %c0_3 = arith.constant 0 : index
    %2 = vector.load %arg2[%c0_2, %c0_3] : memref<16x4xf32, #tpu.memory_space<vmem>>, vector<16x4xf32>
    %cst_4 = arith.constant dense<0.000000e+00> : vector<8x4xf32>
    %3 = tpu.matmul %1, %2, %cst_4 {dimension_numbers = #tpu.dot_dimension_numbers<[1], [0], [0], [1], [0, 0, 1, 1], [], []>} : vector<8x16xf32>, vector<16x4xf32>, vector<8x4xf32> -> vector<8x4xf32>
    %c0_5 = arith.constant 0 : index
    %c0_6 = arith.constant 0 : index
    %4 = vector.load %arg3[%c0_5, %c0_6] : memref<1x4xf32, #tpu.memory_space<vmem>>, vector<1x4xf32>
    %5 = vector.broadcast %4 : vector<1x4xf32> to vector<8x4xf32>
    %6 = arith.addf %3, %5 : vector<8x4xf32>
    %cst_7 = arith.constant 0.000000e+00 : f32
    %7 = vector.broadcast %cst_7 : f32 to vector<8x4xf32>
    %8 = arith.maximumf %6, %7 : vector<8x4xf32>
    %c0_8 = arith.constant 0 : index
    %c0_9 = arith.constant 0 : index
    %9 = vector.load %arg4[%c0_8, %c0_9] : memref<4x16xf32, #tpu.memory_space<vmem>>, vector<4x16xf32>
    %cst_10 = arith.constant dense<0.000000e+00> : vector<8x16xf32>
    %10 = tpu.matmul %8, %9, %cst_10 {dimension_numbers = #tpu.dot_dimension_numbers<[1], [0], [0], [1], [0, 0, 1, 1], [], []>} : vector<8x4xf32>, vector<4x16xf32>, vector<8x16xf32> -> vector<8x16xf32>
    %c0_11 = arith.constant 0 : index
    %c0_12 = arith.constant 0 : index
    %11 = vector.load %arg5[%c0_11, %c0_12] : memref<1x16xf32, #tpu.memory_space<vmem>>, vector<1x16xf32>
    %12 = vector.broadcast %11 : vector<1x16xf32> to vector<8x16xf32>
    %13 = arith.addf %10, %12 : vector<8x16xf32>
    %c0_13 = arith.constant 0 : index
    %c0_14 = arith.constant 0 : index
    %14 = vector.load %arg6[%c0_13, %c0_14] : memref<8x16xf32, #tpu.memory_space<vmem>>, vector<8x16xf32>
    tpu.vector_store %arg6[%c0_13, %c0_14], %13 {strides = array<i32>} : memref<8x16xf32, #tpu.memory_space<vmem>>, vector<8x16xf32>,
    return
  }
  func.func @transform_0(%arg0: i32) -> (i32, i32, i32) {
    %c0_i32 = arith.constant 0 : i32
    %c0_i32_0 = arith.constant 0 : i32
    %c0_i32_1 = arith.constant 0 : i32
    return %arg0, %c0_i32, %c0_i32_0 : i32, i32, i32
  }
  func.func @transform_1(%arg0: i32) -> (i32, i32) {
    %c0_i32 = arith.constant 0 : i32
    %c0_i32_0 = arith.constant 0 : i32
    %c0_i32_1 = arith.constant 0 : i32
    return %c0_i32, %c0_i32_0 : i32, i32
  }
  func.func @transform_2(%arg0: i32) -> (i32, i32) {
    %c0_i32 = arith.constant 0 : i32
    %c0_i32_0 = arith.constant 0 : i32
    %c0_i32_1 = arith.constant 0 : i32
    return %c0_i32, %c0_i32_0 : i32, i32
  }
  func.func @transform_3(%arg0: i32) -> (i32, i32) {
    %c0_i32 = arith.constant 0 : i32
    %c0_i32_0 = arith.constant 0 : i32
    %c0_i32_1 = arith.constant 0 : i32
    return %c0_i32, %c0_i32_0 : i32, i32
  }
  func.func @transform_4(%arg0: i32) -> (i32, i32) {
    %c0_i32 = arith.constant 0 : i32
    %c0_i32_0 = arith.constant 0 : i32
    %c0_i32_1 = arith.constant 0 : i32
    return %c0_i32, %c0_i32_0 : i32, i32
  }
  func.func @transform_5(%arg0: i32) -> (i32, i32) {
    %c0_i32 = arith.constant 0 : i32
    %c0_i32_0 = arith.constant 0 : i32
    return %arg0, %c0_i32 : i32, i32
  }
}

</mosaic_0001>

<bundles_post_ra>
// kernel: tpu_custom_call.1
= control target key start
LH: loop header
LB: loop body
LE: loop exit
PB: predicated region body
PF: predicated region fallthrough
CT: control target
= control target key end

     0   :  { %s489_s18 = smov 0   ;;  %s539_s0 = inlined_call_operand.vmem [shape: f32[24,8,16], index: 0, kind: input, shape index: {}]   ;;  %s540_s1 = inlined_call_operand.vmem [shape: f32[16,4], index: 1, kind: input, shape index: {}]   ;;  %s541_s2 = inlined_call_operand.vmem [shape: f32[1,4], index: 2, kind: input, shape index: {}]   ;;  %s542_s3 = inlined_call_operand.vmem [shape: f32[4,16], index: 3, kind: input, shape index: {}]   ;;  %s543_s4 = inlined_call_operand.vmem [shape: f32[1,16], index: 4, kind: input, shape index: {}]   ;;  %s544_s5 = inlined_call_operand.vmem [shape: f32[24,16], index: 5, kind: output, shape index: {}]  }
   0x1 LB: > { %s495_s19 = sadd.s32 4294967295, %s457_s18   ;;  %p432_p0 = scmp.ge.s32.totalorder %s457_s18, 1  ;;  %s457_s18 = sphi %s489_s18, %s15_s18  }
   0x2   : > { %p188_p1 = scmp.lt.s32.totalorder %s457_s18, 4 }
   0x4   : > { %p189_p2 = pnand %p432_p0, %p188_p1 }
   0x5   : > { %s433_s24 = sshll.u32 (!%p189_p2), %s495_s19, 3  ;;  %p221_p4 = scmp.lt.s32.totalorder (!%p189_p2), %s495_s19, 2 }
   0x6   : > { %192 = sbr.rel (%p189_p2) target bundleno = 294 (0x126), region = 40  ;;  %p216_p3 = scmp.lt.s32.totalorder (!%p189_p2), %s433_s24, 23 }
   0xb   : > { %v291_v0 = vld [vmem:[%s540_s1 + $0x8] sm:$0xff]  ;;  %v290_v1 = vld [vmem:[%s540_s1] sm:$0xff]  ;;  %s546_s24 = smov (!%p216_p3, %s433_s24), 23  ;;  %vm233_vm0 = vcmask 130048   ;;  %vm304_vm1 = vcmask 1041409   ;;  %vm306_vm2 = vcmask 1042434  }
   0xc   : > { %334 = vmatpush.msra.mxu0 %v291_v0  ;;  %s434_s25 = sshll.u32 %s546_s24, 3  ;;  %vm308_vm3 = vcmask 1043459   ;;  %vm310_vm4 = vcmask 1044484   ;;  %vm312_vm5 = vcmask 1045509   ;;  %vm314_vm6 = vcmask 1046534   ;;  %s548_s19 = smov (!%p221_p4, %s495_s19), 2 }
   0xd   : > { %s219_s28 = scalar_lea.vmem %s539_s0, %s434_s25  ;;  %vm316_vm7 = vcmask 1047559   ;;  %vm350_vm8 = vcmask 1043456   ;;  %vm346_vm9 = vcmask 31744   ;;  %s435_s8 = sshll.u32 %s548_s19, 3 }
   0xe   : > { %335 = vmatpush.msra.mxu0 %v290_v1  ;;  %v225_v2 = vld [vmem:[%s219_s28] sm:$0xff]  ;;  %v226_v3 = vld [vmem:[%s219_s28 + $0x8] sm:$0xff]  ;;  %v227_v4 = vld [vmem:[%s219_s28 + $0x10] sm:$0xff]  ;;  %s224_s13 = scalar_lea.vmem %s544_s5, %s435_s8 }
   0xf   : > { %v228_v5 = vld [vmem:[%s219_s28 + $0x18] sm:$0xff]  ;;  %v229_v6 = vld [vmem:[%s219_s28 + $0x20] sm:$0xff]  ;;  %v230_v7 = vld [vmem:[%s219_s28 + $0x28] sm:$0xff]  ;;  %v234_v8 = vsel %vm233_vm0, %v225_v2, -inf  ;;  %v241_v9 = vsel %vm233_vm0, %v226_v3, -inf  ;;  %v248_v10 = vsel %vm233_vm0, %v227_v4, -inf }
  0x10   : > { %v231_v11 = vld [vmem:[%s219_s28 + $0x30] sm:$0xff]  ;;  %v232_v12 = vld [vmem:[%s219_s28 + $0x38] sm:$0xff]  ;;  %v235_v13 = vrot.slane %v234_v8, 4  ;;  %v242_v14 = vrot.slane %v241_v9, 4  ;;  %v249_v15 = vrot.slane %v248_v10, 4  ;;  %v255_v16 = vsel %vm233_vm0, %v228_v5, -inf }
  0x11   : > { %v256_v17 = vrot.slane %v255_v16, 4  ;;  %v262_v18 = vsel %vm233_vm0, %v229_v6, -inf  ;;  %v269_v19 = vsel %vm233_vm0, %v230_v7, -inf  ;;  %v276_v20 = vsel %vm233_vm0, %v231_v11, -inf }
  0x12   : > { %v236_v21 = vmax.f32 %v234_v8, %v235_v13  ;;  %v243_v22 = vmax.f32 %v241_v9, %v242_v14  ;;  %v250_v23 = vmax.f32 %v248_v10, %v249_v15  ;;  %v263_v24 = vrot.slane %v262_v18, 4  ;;  %v341_v9 = vld [vmem:[%s542_s3] sm:$0xf] }
  0x13   : > { %v257_v25 = vmax.f32 %v255_v16, %v256_v17  ;;  %v270_v26 = vrot.slane %v269_v19, 4  ;;  %v277_v27 = vrot.slane %v276_v20, 4  ;;  %v283_v28 = vsel %vm233_vm0, %v232_v12, -inf  ;;  %437 = vmatpush.msk.msra.mxu1 %vm350_vm8, %v341_v9  ;;  %v449_v10 = vld [vmem:[%s541_s2] ss:$0 sm:$0xff] }
  0x14   : > { %v237_v29 = vrot.slane %v236_v21, 2  ;;  %v244_v30 = vrot.slane %v243_v22, 2  ;;  %v251_v31 = vrot.slane %v250_v23, 2  ;;  %v264_v32 = vmax.f32 %v262_v18, %v263_v24  ;;  %v450_v14 = vld [vmem:[%s543_s4] ss:$0 sm:$0xff] }
  0x15   : > { %v258_v33 = vrot.slane %v257_v25, 2  ;;  %v271_v34 = vmax.f32 %v269_v19, %v270_v26  ;;  %v278_v35 = vmax.f32 %v276_v20, %v277_v27  ;;  %v284_v36 = vrot.slane %v283_v28, 4 }
  0x16   : > { %v238_v37 = vmax.f32 %v236_v21, %v237_v29  ;;  %v245_v38 = vmax.f32 %v243_v22, %v244_v30  ;;  %v252_v39 = vmax.f32 %v250_v23, %v251_v31  ;;  %v265_v40 = vrot.slane %v264_v32, 2 }
  0x17   : > { %v259_v41 = vmax.f32 %v257_v25, %v258_v33  ;;  %v272_v42 = vrot.slane %v271_v34, 2  ;;  %v279_v43 = vrot.slane %v278_v35, 2  ;;  %v285_v44 = vmax.f32 %v283_v28, %v284_v36 }
  0x18   : > { %v239_v45 = vrot.slane %v238_v37, 1  ;;  %v246_v46 = vrot.slane %v245_v38, 1  ;;  %v253_v47 = vrot.slane %v252_v39, 1  ;;  %v266_v48 = vmax.f32 %v264_v32, %v265_v40 }
  0x19   : > { %v260_v49 = vrot.slane %v259_v41, 1  ;;  %v273_v50 = vmax.f32 %v271_v34, %v272_v42  ;;  %v280_v51 = vmax.f32 %v278_v35, %v279_v43  ;;  %v286_v52 = vrot.slane %v285_v44, 2 }
  0x1a   : > { %v240_v53 = vmax.f32 %v238_v37, %v239_v45  ;;  %v247_v54 = vmax.f32 %v245_v38, %v246_v46  ;;  %v254_v55 = vmax.f32 %v252_v39, %v253_v47  ;;  %v267_v56 = vrot.slane %v266_v48, 1 }
  0x1b   : > { %v261_v57 = vmax.f32 %v259_v41, %v260_v49  ;;  %v274_v58 = vrot.slane %v273_v50, 1  ;;  %v281_v59 = vrot.slane %v280_v51, 1  ;;  %v287_v60 = vmax.f32 %v285_v44, %v286_v52 }
  0x1c   : > { %v268_v61 = vmax.f32 %v266_v48, %v267_v56  ;;  %v305_v62 = vsel %vm304_vm1, %v247_v54, %v240_v53 }
  0x1d   : > { %v275_v63 = vmax.f32 %v273_v50, %v274_v58  ;;  %v282_v0 = vmax.f32 %v280_v51, %v281_v59  ;;  %v288_v1 = vrot.slane %v287_v60, 1  ;;  %v307_v2 = vsel %vm306_vm2, %v254_v55, %v305_v62 }
  0x1e   : > { %v309_v3 = vsel %vm308_vm3, %v261_v57, %v307_v2 }
  0x1f   : > { %v289_v4 = vmax.f32 %v287_v60, %v288_v1  ;;  %v311_v5 = vsel %vm310_vm4, %v268_v61, %v309_v3 }
  0x20   : > { %v313_v6 = vsel %vm312_vm5, %v275_v63, %v311_v5 }
  0x21   : > { %v315_v7 = vsel %vm314_vm6, %v282_v0, %v313_v6 }
  0x22   : > { %v317_v8 = vsel %vm316_vm7, %v289_v4, %v315_v7 }
  0x23   : > { %436 = vmatmul.msk.f32.vlgmr.msra.gmra.mxu0 %vm233_vm0, %v317_v8 }
  0xa0   : > { %v337_v11 = vpop.f32.mrf.mxu0 }
  0xa1   : > { %v338_v12 = vadd.f32 %v449_v10, %v337_v11 }
  0xa3   : > { %v340_v13 = vmax.f32 %v338_v12, 0.0 }
  0xa5   : > { %438 = vmatmul.msk.f32.vlgmr.msra.gmra.mxu1 %vm346_vm9, %v340_v13 }
 0x122   : > { %v371_v15 = vpop.f32.mrf.mxu1 }
 0x123   : > { %v372_v16 = vadd.f32 %v450_v14, %v371_v15 }
 0x125   : > { %374 = vst.msk [vmem:[%s224_s13] sm:$0xff] %vm233_vm0, %v372_v16 }
 0x126 PF: > { %s15_s18 = sadd.s32 1, %s457_s18  }
 0x127   : > { %p12_p5 = scmp.ge.s32.totalorder %s15_s18, 5  }
 0x129   :  { %14 = sbr.rel (!%p12_p5) target bundleno = 1 (0x1), region = 70 }

</bundles_post_ra>
